<compile_context>
chip_gen: v7x
topology: tpu7x:2x2x1
jax: 0.10.0
libtpu: 0.0.40
codegen_flags: <defaults>
</compile_context>

<pallas_src>
import jax
import jax.numpy as jnp
from jax.experimental import pallas as pl
from jax.experimental.pallas import tpu as pltpu


def _round_up(x: int, m: int) -> int:
    return ((x + m - 1) // m) * m


def _make_mlp_kernel(num_linear_layers: int):
    """Build a kernel computing the whole MLP for one batch tile in VMEM."""

    def kernel(*refs):
        x_ref = refs[0]
        o_ref = refs[-1]
        param_refs = refs[1:-1]  # alternating (W_t, b) pairs

        cdt = param_refs[0].dtype          # MXU feed dtype (bf16 or f32)
        h = x_ref[...].astype(cdt)         # cast happens in-kernel (no extra HBM pass)
        for l in range(num_linear_layers):
            w = param_refs[2 * l][...]     # (in_pad, out_pad), compute dtype
            b = param_refs[2 * l + 1][...] # (1, out_pad), float32
            acc = jnp.dot(h, w, preferred_element_type=jnp.float32) + b
            if l < num_linear_layers - 1:  # ReLU after every layer but the last
                h = jnp.maximum(acc, 0.0).astype(cdt)
            else:
                h = acc                    # last layer stays in f32 until store
        o_ref[...] = h.astype(o_ref.dtype)

    return kernel


def prepare_branch_net_params(params, *, compute_dtype=jnp.bfloat16, lane=128):
    """One-time conversion from PyTorch-layout params to kernel layout.

    params: list of (W, b) with W of shape (out_feat, in_feat) (PyTorch layout).
    Every layer's output dim (and, for layers > 0, input dim) is zero-padded to a
    multiple of `lane` so all in-kernel tiles are lane-dense.  Returns a list of
    (W_t, b_row): W_t is (in_pad, out_pad) in compute_dtype, b_row is (1, out_pad)
    float32.  Zero padding + ReLU(0)=0 keeps the math exactly equivalent.
    """
    prepped = []
    for i, (w, b) in enumerate(params):
        w = jnp.asarray(w, jnp.float32)    # (out_feat, in_feat)
        b = jnp.asarray(b, jnp.float32)
        out_feat, in_feat = w.shape
        pad_out = _round_up(out_feat, lane) - out_feat
        pad_in = 0 if i == 0 else _round_up(in_feat, lane) - in_feat
        if pad_out or pad_in:
            w = jnp.pad(w, ((0, pad_out), (0, pad_in)))
            b = jnp.pad(b, ((0, pad_out),))
        prepped.append((w.T.astype(compute_dtype), b.reshape(1, -1)))
    return prepped


def branch_net_forward(x, prepped_params, *, output_size, batch_tile=None,
                       out_dtype=None):
    """Run the BranchNet forward pass with a Pallas TPU kernel.

    x:               (batch, input_size) array (float32 is fine; cast is in-kernel)
    prepped_params:  output of prepare_branch_net_params
    output_size:     true (unpadded) output feature count
    out_dtype:       dtype of the kernel's stored output (defaults to the compute
                     dtype, i.e. bf16 on the fast path, f32 on the f32-feed path)
    """
    batch, in_features = x.shape
    compute_dtype = prepped_params[0][0].dtype
    if out_dtype is None:
        out_dtype = compute_dtype
    padded_out = prepped_params[-1][1].shape[1]
    num_linear = len(prepped_params)

    # --- device info ------------------------------------------------------------
    kind = ""
    try:
        kind = jax.devices()[0].device_kind.lower()
    except Exception:
        pass
    two_tc = ("v7" in kind) or ("7x" in kind)       # v7x: 2 TensorCores per chip
    try:
        vmem_cap = int(pltpu.get_tpu_info().vmem_capacity_bytes)
    except Exception:
        vmem_cap = 64 << 20                         # conservative (v7x per-TC)

    # --- batch tile selection -----------------------------------------------------
    cdt_size = jnp.dtype(compute_dtype).itemsize
    sub = 16 if cdt_size == 2 else 8                # bf16 vreg packs (16,128)
    if batch_tile is None:
        batch_tile = 512                            # big tiles amortize per-step cost
    batch_tile = max(sub, _round_up(batch_tile, sub))

    aligned_batch = _round_up(batch, sub)
    batch_tile = min(batch_tile, aligned_batch)
    # v7x: split across both TensorCores only when each core gets a full,
    # well-packed tile (>= 256 rows); never emit tiny ragged steps.
    if two_tc and batch_tile == aligned_batch and aligned_batch >= 512:
        batch_tile = _round_up(pl.cdiv(aligned_batch, 2), sub)

    padded_batch = _round_up(batch, batch_tile)
    xin = x
    if padded_batch != batch:
        xin = jnp.pad(x, ((0, padded_batch - batch), (0, 0)))

    flat_params = [t for pair in prepped_params for t in pair]
    grid = (padded_batch // batch_tile,)

    # x tiled over batch; parameters replicated (constant block index => DMA'd once).
    in_specs = [pl.BlockSpec((batch_tile, in_features), lambda i: (i, 0))]
    for p in flat_params:
        in_specs.append(pl.BlockSpec(p.shape, lambda i: (0, 0)))
    out_spec = pl.BlockSpec((batch_tile, padded_out), lambda i: (i, 0))

    # --- cost estimate + VMEM budget ---------------------------------------------
    x_size = jnp.dtype(xin.dtype).itemsize
    out_size = jnp.dtype(out_dtype).itemsize
    flops = 0
    param_bytes = 0
    for w_t, b_row in prepped_params:
        flops += 2 * padded_batch * int(w_t.shape[0]) * int(w_t.shape[1])
        param_bytes += int(w_t.size) * cdt_size + int(b_row.size) * 4
    io_bytes = padded_batch * in_features * x_size + padded_batch * padded_out * out_size
    cost = pl.CostEstimate(flops=flops, transcendentals=0,
                           bytes_accessed=param_bytes + io_bytes)

    widest = max(int(w_t.shape[1]) for w_t, _ in prepped_params)
    vmem_bytes = (2 * batch_tile * in_features * x_size     # x double buffer
                  + 2 * batch_tile * padded_out * out_size  # out double buffer
                  + 2 * param_bytes                         # params (double-buffered)
                  + batch_tile * widest * (4 + cdt_size))   # f32 acc + cdt activation
    compiler_kwargs = dict(dimension_semantics=("parallel",))
    # v5e's default scoped-VMEM limit is 16 MiB; raise whenever we'd exceed it,
    # leaving headroom below physical capacity (~48 MiB cap on v7x, ~100 MiB else).
    vmem_cap_limit = min(max(vmem_cap - (16 << 20), 32 << 20), 100 << 20)
    if vmem_bytes > (15 << 20):
        compiler_kwargs["vmem_limit_bytes"] = min(
            max(int(vmem_bytes * 5 // 4), 32 << 20), vmem_cap_limit)

    fn = pl.pallas_call(
        _make_mlp_kernel(num_linear),
        out_shape=jax.ShapeDtypeStruct((padded_batch, padded_out), out_dtype),
        grid=grid,
        in_specs=in_specs,
        out_specs=out_spec,
        compiler_params=pltpu.CompilerParams(**compiler_kwargs),
        cost_estimate=cost,
    )
    out = fn(xin, *flat_params)
    return out[:batch, :output_size]


def init_branch_net_params(key, input_size, hidden_size, output_size,
                           num_hidden_layers):
    """Deterministic parameter init matching the PyTorch module's shapes."""
    dims = [input_size] + [hidden_size] * num_hidden_layers + [output_size]
    params = []
    for i in range(len(dims) - 1):
        fan_in, fan_out = dims[i], dims[i + 1]
        key, kw, kb = jax.random.split(key, 3)
        bound = 1.0 / (fan_in ** 0.5)  # PyTorch default Linear init range
        w = jax.random.uniform(kw, (fan_out, fan_in), jnp.float32, -bound, bound)
        b = jax.random.uniform(kb, (fan_out,), jnp.float32, -bound, bound)
        params.append((w, b))
    return params


def branch_net_reference(x, params):
    """Pure-JAX reference of the PyTorch forward pass (f32)."""
    h = x
    n = len(params)
    for i, (w, b) in enumerate(params):
        h = h @ w.T + b
        if i < n - 1:
            h = jnp.maximum(h, 0.0)
    return h


if __name__ == "__main__":
    # Small shapes consistent with BranchNet(input_size, hidden, output, L).
    batch = 16
    input_size = 32
    hidden_size = 64
    output_size = 48
    num_hidden_layers = 3

    key = jax.random.PRNGKey(0)
    key, kx = jax.random.split(key)
    x = jax.random.normal(kx, (batch, input_size), dtype=jnp.float32)
    params = init_branch_net_params(
        key, input_size, hidden_size, output_size, num_hidden_layers
    )
    ref = branch_net_reference(x, params)

    # 1) f32 feed path (f32 output): tight check against the PyTorch-equivalent ref.
    prep_f32 = prepare_branch_net_params(params, compute_dtype=jnp.float32)
    out_f32 = jax.block_until_ready(
        branch_net_forward(x, prep_f32, output_size=output_size)
    )
    assert out_f32.shape == (batch, output_size)
    assert out_f32.dtype == jnp.float32
    assert jnp.allclose(out_f32, ref, atol=1e-4, rtol=1e-4), "f32 mismatch vs reference"

    # 2) bf16 feed / f32 accumulate / bf16 store (the fast production config).
    prep_bf16 = prepare_branch_net_params(params)  # bfloat16 by default
    out_bf16 = jax.block_until_ready(
        branch_net_forward(x, prep_bf16, output_size=output_size)
    )
    assert out_bf16.shape == (batch, output_size)
    rel_err = float(jnp.max(jnp.abs(out_bf16.astype(jnp.float32) - ref)) /
                    (jnp.max(jnp.abs(ref)) + 1e-12))
    assert rel_err < 5e-2, f"bf16 path mismatch vs reference (rel_err={rel_err})"

    print("KERNEL_OK")
</pallas_src>

<mosaic_0001>
module attributes {stable_mosaic.version = 11 : i64} {
  func.func @kernel(%arg0: i32, %arg1: memref<16x32xf32, #tpu.memory_space<vmem>>, %arg2: memref<32x128xf32, #tpu.memory_space<vmem>>, %arg3: memref<1x128xf32, #tpu.memory_space<vmem>>, %arg4: memref<128x128xf32, #tpu.memory_space<vmem>>, %arg5: memref<1x128xf32, #tpu.memory_space<vmem>>, %arg6: memref<128x128xf32, #tpu.memory_space<vmem>>, %arg7: memref<1x128xf32, #tpu.memory_space<vmem>>, %arg8: memref<128x128xf32, #tpu.memory_space<vmem>>, %arg9: memref<1x128xf32, #tpu.memory_space<vmem>>, %arg10: memref<16x128xf32, #tpu.memory_space<vmem>>) attributes {dimension_semantics = [#tpu.dimension_semantics<parallel>], iteration_bounds = array<i64: 1>, scalar_prefetch = 0 : i64, scratch_operands = 0 : i64, tpu.core_type = #tpu.core_type<tc>, window_params = [{transform_indices = @transform_0, window_bounds = array<i64: 16, 32>}, {pipeline_mode = #tpu.pipeline_mode<synchronous>, transform_indices = @transform_1, window_bounds = array<i64: 32, 128>}, {pipeline_mode = #tpu.pipeline_mode<synchronous>, transform_indices = @transform_2, window_bounds = array<i64: 1, 128>}, {pipeline_mode = #tpu.pipeline_mode<synchronous>, transform_indices = @transform_3, window_bounds = array<i64: 128, 128>}, {pipeline_mode = #tpu.pipeline_mode<synchronous>, transform_indices = @transform_4, window_bounds = array<i64: 1, 128>}, {pipeline_mode = #tpu.pipeline_mode<synchronous>, transform_indices = @transform_5, window_bounds = array<i64: 128, 128>}, {pipeline_mode = #tpu.pipeline_mode<synchronous>, transform_indices = @transform_6, window_bounds = array<i64: 1, 128>}, {pipeline_mode = #tpu.pipeline_mode<synchronous>, transform_indices = @transform_7, window_bounds = array<i64: 128, 128>}, {pipeline_mode = #tpu.pipeline_mode<synchronous>, transform_indices = @transform_8, window_bounds = array<i64: 1, 128>}, {transform_indices = @transform_9, window_bounds = array<i64: 16, 128>}]} {
    %c0 = arith.constant 0 : index
    %c0_0 = arith.constant 0 : index
    %0 = vector.load %arg1[%c0, %c0_0] : memref<16x32xf32, #tpu.memory_space<vmem>>, vector<16x32xf32>
    %c0_1 = arith.constant 0 : index
    %c0_2 = arith.constant 0 : index
    %1 = vector.load %arg2[%c0_1, %c0_2] : memref<32x128xf32, #tpu.memory_space<vmem>>, vector<32x128xf32>
    %c0_3 = arith.constant 0 : index
    %c0_4 = arith.constant 0 : index
    %2 = vector.load %arg3[%c0_3, %c0_4] : memref<1x128xf32, #tpu.memory_space<vmem>>, vector<1x128xf32>
    %cst = arith.constant dense<0.000000e+00> : vector<16x128xf32>
    %3 = tpu.matmul %0, %1, %cst {dimension_numbers = #tpu.dot_dimension_numbers<[1], [0], [0], [1], [0, 0, 1, 1], [], []>} : vector<16x32xf32>, vector<32x128xf32>, vector<16x128xf32> -> vector<16x128xf32>
    %4 = vector.broadcast %2 : vector<1x128xf32> to vector<16x128xf32>
    %5 = arith.addf %3, %4 : vector<16x128xf32>
    %cst_5 = arith.constant 0.000000e+00 : f32
    %6 = vector.broadcast %cst_5 : f32 to vector<16x128xf32>
    %7 = arith.maximumf %5, %6 : vector<16x128xf32>
    %c0_6 = arith.constant 0 : index
    %c0_7 = arith.constant 0 : index
    %8 = vector.load %arg4[%c0_6, %c0_7] : memref<128x128xf32, #tpu.memory_space<vmem>>, vector<128x128xf32>
    %c0_8 = arith.constant 0 : index
    %c0_9 = arith.constant 0 : index
    %9 = vector.load %arg5[%c0_8, %c0_9] : memref<1x128xf32, #tpu.memory_space<vmem>>, vector<1x128xf32>
    %cst_10 = arith.constant dense<0.000000e+00> : vector<16x128xf32>
    %10 = tpu.matmul %7, %8, %cst_10 {dimension_numbers = #tpu.dot_dimension_numbers<[1], [0], [0], [1], [0, 0, 1, 1], [], []>} : vector<16x128xf32>, vector<128x128xf32>, vector<16x128xf32> -> vector<16x128xf32>
    %11 = vector.broadcast %9 : vector<1x128xf32> to vector<16x128xf32>
    %12 = arith.addf %10, %11 : vector<16x128xf32>
    %cst_11 = arith.constant 0.000000e+00 : f32
    %13 = vector.broadcast %cst_11 : f32 to vector<16x128xf32>
    %14 = arith.maximumf %12, %13 : vector<16x128xf32>
    %c0_12 = arith.constant 0 : index
    %c0_13 = arith.constant 0 : index
    %15 = vector.load %arg6[%c0_12, %c0_13] : memref<128x128xf32, #tpu.memory_space<vmem>>, vector<128x128xf32>
    %c0_14 = arith.constant 0 : index
    %c0_15 = arith.constant 0 : index
    %16 = vector.load %arg7[%c0_14, %c0_15] : memref<1x128xf32, #tpu.memory_space<vmem>>, vector<1x128xf32>
    %cst_16 = arith.constant dense<0.000000e+00> : vector<16x128xf32>
    %17 = tpu.matmul %14, %15, %cst_16 {dimension_numbers = #tpu.dot_dimension_numbers<[1], [0], [0], [1], [0, 0, 1, 1], [], []>} : vector<16x128xf32>, vector<128x128xf32>, vector<16x128xf32> -> vector<16x128xf32>
    %18 = vector.broadcast %16 : vector<1x128xf32> to vector<16x128xf32>
    %19 = arith.addf %17, %18 : vector<16x128xf32>
    %cst_17 = arith.constant 0.000000e+00 : f32
    %20 = vector.broadcast %cst_17 : f32 to vector<16x128xf32>
    %21 = arith.maximumf %19, %20 : vector<16x128xf32>
    %c0_18 = arith.constant 0 : index
    %c0_19 = arith.constant 0 : index
    %22 = vector.load %arg8[%c0_18, %c0_19] : memref<128x128xf32, #tpu.memory_space<vmem>>, vector<128x128xf32>
    %c0_20 = arith.constant 0 : index
    %c0_21 = arith.constant 0 : index
    %23 = vector.load %arg9[%c0_20, %c0_21] : memref<1x128xf32, #tpu.memory_space<vmem>>, vector<1x128xf32>
    %cst_22 = arith.constant dense<0.000000e+00> : vector<16x128xf32>
    %24 = tpu.matmul %21, %22, %cst_22 {dimension_numbers = #tpu.dot_dimension_numbers<[1], [0], [0], [1], [0, 0, 1, 1], [], []>} : vector<16x128xf32>, vector<128x128xf32>, vector<16x128xf32> -> vector<16x128xf32>
    %25 = vector.broadcast %23 : vector<1x128xf32> to vector<16x128xf32>
    %26 = arith.addf %24, %25 : vector<16x128xf32>
    %c0_23 = arith.constant 0 : index
    %c0_24 = arith.constant 0 : index
    %27 = vector.load %arg10[%c0_23, %c0_24] : memref<16x128xf32, #tpu.memory_space<vmem>>, vector<16x128xf32>
    tpu.vector_store %arg10[%c0_23, %c0_24], %26 {strides = array<i32>} : memref<16x128xf32, #tpu.memory_space<vmem>>, vector<16x128xf32>,
    return
  }
  func.func @transform_0(%arg0: i32) -> (i32, i32) {
    %c0_i32 = arith.constant 0 : i32
    %c0_i32_0 = arith.constant 0 : i32
    return %arg0, %c0_i32 : i32, i32
  }
  func.func @transform_1(%arg0: i32) -> (i32, i32) {
    %c0_i32 = arith.constant 0 : i32
    %c0_i32_0 = arith.constant 0 : i32
    %c0_i32_1 = arith.constant 0 : i32
    return %c0_i32, %c0_i32_0 : i32, i32
  }
  func.func @transform_2(%arg0: i32) -> (i32, i32) {
    %c0_i32 = arith.constant 0 : i32
    %c0_i32_0 = arith.constant 0 : i32
    %c0_i32_1 = arith.constant 0 : i32
    return %c0_i32, %c0_i32_0 : i32, i32
  }
  func.func @transform_3(%arg0: i32) -> (i32, i32) {
    %c0_i32 = arith.constant 0 : i32
    %c0_i32_0 = arith.constant 0 : i32
    %c0_i32_1 = arith.constant 0 : i32
    return %c0_i32, %c0_i32_0 : i32, i32
  }
  func.func @transform_4(%arg0: i32) -> (i32, i32) {
    %c0_i32 = arith.constant 0 : i32
    %c0_i32_0 = arith.constant 0 : i32
    %c0_i32_1 = arith.constant 0 : i32
    return %c0_i32, %c0_i32_0 : i32, i32
  }
  func.func @transform_5(%arg0: i32) -> (i32, i32) {
    %c0_i32 = arith.constant 0 : i32
    %c0_i32_0 = arith.constant 0 : i32
    %c0_i32_1 = arith.constant 0 : i32
    return %c0_i32, %c0_i32_0 : i32, i32
  }
  func.func @transform_6(%arg0: i32) -> (i32, i32) {
    %c0_i32 = arith.constant 0 : i32
    %c0_i32_0 = arith.constant 0 : i32
    %c0_i32_1 = arith.constant 0 : i32
    return %c0_i32, %c0_i32_0 : i32, i32
  }
  func.func @transform_7(%arg0: i32) -> (i32, i32) {
    %c0_i32 = arith.constant 0 : i32
    %c0_i32_0 = arith.constant 0 : i32
    %c0_i32_1 = arith.constant 0 : i32
    return %c0_i32, %c0_i32_0 : i32, i32
  }
  func.func @transform_8(%arg0: i32) -> (i32, i32) {
    %c0_i32 = arith.constant 0 : i32
    %c0_i32_0 = arith.constant 0 : i32
    %c0_i32_1 = arith.constant 0 : i32
    return %c0_i32, %c0_i32_0 : i32, i32
  }
  func.func @transform_9(%arg0: i32) -> (i32, i32) {
    %c0_i32 = arith.constant 0 : i32
    %c0_i32_0 = arith.constant 0 : i32
    return %arg0, %c0_i32 : i32, i32
  }
}

</mosaic_0001>

<bundles_post_ra>
// kernel: tpu_custom_call.1
= control target key start
LH: loop header
LB: loop body
LE: loop exit
PB: predicated region body
PF: predicated region fallthrough
CT: control target
= control target key end

     0   :  { %14 = vsyncpa [#allocation3], 0  ;;  %s1127_s0 = inlined_call_operand.hbm [shape: f32[16,32], index: 0, kind: input, shape index: {}]   ;;  %s1128_s1 = inlined_call_operand.hbm [shape: f32[32,128], index: 1, kind: input, shape index: {}]   ;;  %s1129_s2 = inlined_call_operand.vmem [shape: f32[1,128], index: 2, kind: input, shape index: {}]   ;;  %s1130_s3 = inlined_call_operand.hbm [shape: f32[128,128], index: 3, kind: input, shape index: {}]   ;;  %s1131_s4 = inlined_call_operand.vmem [shape: f32[1,128], index: 4, kind: input, shape index: {}]   ;;  %s1132_s5 = inlined_call_operand.hbm [shape: f32[128,128], index: 5, kind: input, shape index: {}]   ;;  %s1133_s6 = inlined_call_operand.vmem [shape: f32[1,128], index: 6, kind: input, shape index: {}]   ;;  %s1134_s7 = inlined_call_operand.hbm [shape: f32[128,128], index: 7, kind: input, shape index: {}]   ;;  %s1135_s8 = inlined_call_operand.vmem [shape: f32[1,128], index: 8, kind: input, shape index: {}]   ;;  %s1136_s9 = inlined_call_operand.hbm [shape: f32[16,128], index: 9, kind: output, shape index: {}]  }
   0x1   :  { %15 = vsyncpa [#allocation6], 0 }
   0x2   :  { %16 = vsyncpa [#allocation9], 0 }
   0x3   :  { %17 = vsyncpa [#allocation4], 0  ;;  %s951_s30 = smov [#allocation5]   ;;  %s952_s11 = smov [#allocation8]  }
   0x4   :  { %s35_s10 = sshll.u32 %s951_s30, 4  ;;  %s63_s12 = sshll.u32 %s952_s11, 4  ;;  %s36_s10 = int_to_ptr.vmem [resolvable:$true] %s35_s10  ;;  %s1009_s12 = int_to_ptr.vmem [resolvable:$true] %s63_s12 }
   0x5   :  { %s811_s15 = scalar_lea.hbm %s1128_s1, 512 }
   0x6   :  { %p812_p0 = scmp.ne.s32.totalorder %s1128_s1, %s811_s15  ;;  %p815_p1 = scmp.lt.u32.totalorder %s811_s15, %s1128_s1 }
   0x8   :  { %p817_p2 = pnand %p815_p1, %p812_p0 }
   0xa   :  { %820 = shalt.err (!%p817_p2)
}
   0xb   :  { %s821_s20 = scalar_lea.vmem %s36_s10, 512  ;;  %p826_p4 = scmp.lt.s32.totalorder %s36_s10, %s36_s10 }
   0xc   :  { %p822_p3 = scmp.ne.s32.totalorder %s36_s10, %s821_s20  ;;  %p827_p5 = scmp.lt.s32.totalorder %s821_s20, %s821_s20 }
   0xe   :  { %p828_p6 = por %p827_p5, %p826_p4 }
  0x10   :  { %p829_p7 = pnand %p828_p6, %p822_p3 }
  0x12   :  { %832 = shalt.err (!%p829_p7)
}
  0x13   :  { %s953_s21 = smov 128   ;;  %s954_s22 = smov 8  }
  0x14   :  { %41 = dma.hbm_to_vmem [thread:$0]  %s1128_s1, 512, %s36_s10, [#allocation6], %s953_s21, %s953_s21, %s954_s22  }
  0x15   :  { %s833_s27 = scalar_lea.hbm %s1132_s5, 2048 }
  0x16   :  { %p834_p8 = scmp.ne.s32.totalorder %s1132_s5, %s833_s27  ;;  %p837_p9 = scmp.lt.u32.totalorder %s833_s27, %s1132_s5 }
  0x18   :  { %p839_p10 = pnand %p837_p9, %p834_p8 }
  0x1a   :  { %842 = shalt.err (!%p839_p10)
}
  0x1b   :  { %s843_s13 = scalar_lea.vmem %s1009_s12, 2048  ;;  %p848_p12 = scmp.lt.s32.totalorder %s1009_s12, %s1009_s12 }
  0x1c   :  { %p844_p11 = scmp.ne.s32.totalorder %s1009_s12, %s843_s13  ;;  %p849_p13 = scmp.lt.s32.totalorder %s843_s13, %s843_s13 }
  0x1e   :  { %p850_p0 = por %p849_p13, %p848_p12 }
  0x20   :  { %p851_p1 = pnand %p850_p0, %p844_p11 }
  0x22   :  { %854 = shalt.err (!%p851_p1)
}
  0x23   :  { %69 = dma.hbm_to_vmem [thread:$0]  %s1132_s5, 2048, %s1009_s12, [#allocation9], %s953_s21, %s953_s21, %s954_s22  }
  0x24   :  { %s955_s14 = smov [#allocation2]   ;;  %s956_s16 = smov [#allocation7]  }
  0x25   :  { %s23_s15 = sshll.u32 %s955_s14, 4  ;;  %s49_s17 = sshll.u32 %s956_s16, 4  ;;  %s24_s15 = int_to_ptr.vmem [resolvable:$true] %s23_s15  ;;  %s1046_s17 = int_to_ptr.vmem [resolvable:$true] %s49_s17 }
  0x26   :  { %s855_s20 = scalar_lea.hbm %s1127_s0, 256 }
  0x27   :  { %p856_p2 = scmp.ne.s32.totalorder %s1127_s0, %s855_s20  ;;  %p859_p3 = scmp.lt.u32.totalorder %s855_s20, %s1127_s0 }
  0x29   :  { %p861_p4 = pnand %p859_p3, %p856_p2 }
  0x2b   :  { %864 = shalt.err (!%p861_p4)
}
  0x2c   :  { %s865_s5 = scalar_lea.vmem %s24_s15, 256  ;;  %p870_p6 = scmp.lt.s32.totalorder %s24_s15, %s24_s15 }
  0x2d   :  { %p866_p5 = scmp.ne.s32.totalorder %s24_s15, %s865_s5  ;;  %p871_p7 = scmp.lt.s32.totalorder %s865_s5, %s865_s5 }
  0x2f   :  { %p872_p8 = por %p871_p7, %p870_p6 }
  0x31   :  { %p873_p9 = pnand %p872_p8, %p866_p5 }
  0x33   :  { %876 = shalt.err (!%p873_p9)
}
  0x34   :  { %29 = dma.hbm_to_vmem [thread:$0]  %s1127_s0, 256, %s24_s15, [#allocation3], %s953_s21, %s953_s21, %s954_s22  }
  0x35   :  { %s877_s30 = scalar_lea.hbm %s1130_s3, 2048 }
  0x36   :  { %p878_p10 = scmp.ne.s32.totalorder %s1130_s3, %s877_s30  ;;  %p881_p11 = scmp.lt.u32.totalorder %s877_s30, %s1130_s3 }
  0x38   :  { %p883_p12 = pnand %p881_p11, %p878_p10 }
  0x3a   :  { %886 = shalt.err (!%p883_p12)
}
  0x3b   :  { %s887_s14 = scalar_lea.vmem %s1046_s17, 2048  ;;  %p892_p0 = scmp.lt.s32.totalorder %s1046_s17, %s1046_s17 }
  0x3c   :  { %p888_p13 = scmp.ne.s32.totalorder %s1046_s17, %s887_s14  ;;  %p893_p1 = scmp.lt.s32.totalorder %s887_s14, %s887_s14 }
  0x3e   :  { %p894_p2 = por %p893_p1, %p892_p0 }
  0x40   :  { %p895_p3 = pnand %p894_p2, %p888_p13 }
  0x42   :  { %898 = shalt.err (!%p895_p3)
}
  0x43   :  { %55 = dma.hbm_to_vmem [thread:$0]  %s1130_s3, 2048, %s1046_s17, [#allocation6], %s953_s21, %s953_s21, %s954_s22  }
  0x44   :  { %s957_s16 = smov [#allocation10]   ;;  %s899_s23 = scalar_lea.hbm %s1134_s7, 2048 }
  0x45   :  { %s77_s18 = sshll.u32 %s957_s16, 4  ;;  %p900_p4 = scmp.ne.s32.totalorder %s1134_s7, %s899_s23  ;;  %s78_s18 = int_to_ptr.vmem [resolvable:$true] %s77_s18 }
  0x46   :  { %p903_p5 = scmp.lt.u32.totalorder %s899_s23, %s1134_s7 }
  0x48   :  { %p905_p6 = pnand %p903_p5, %p900_p4 }
  0x4a   :  { %908 = shalt.err (!%p905_p6)
}
  0x4b   :  { %s909_s12 = scalar_lea.vmem %s78_s18, 2048  ;;  %p914_p8 = scmp.lt.s32.totalorder %s78_s18, %s78_s18 }
  0x4c   :  { %p910_p7 = scmp.ne.s32.totalorder %s78_s18, %s909_s12  ;;  %p915_p9 = scmp.lt.s32.totalorder %s909_s12, %s909_s12 }
  0x4e   :  { %p916_p10 = por %p915_p9, %p914_p8 }
  0x50   :  { %p917_p11 = pnand %p916_p10, %p910_p7 }
  0x52   :  { %920 = shalt.err (!%p917_p11)
}
  0x53   :  { %83 = dma.hbm_to_vmem [thread:$0]  %s1134_s7, 2048, %s78_s18, [#allocation9], %s953_s21, %s953_s21, %s954_s22  }
  0x54   :  { %943 = dma.done.wait [#allocation3], 256  }
  0x55   :  { %944 = vsyncadd [#allocation3], 4294967040 }
  0x56   :  { %945 = dma.done.wait [#allocation6], 2560  }
  0x57   :  { %946 = vsyncadd [#allocation6], 4294964736 }
  0x58   :  { %947 = dma.done.wait [#allocation9], 4096  }
  0x59   :  { %948 = vsyncadd [#allocation9], 4294963200  ;;  %vm114_vm0 = vcmask 261120   ;;  %v103_v0 = vld [vmem:[#allocation5] sm:$0xff]  ;;  %v104_v1 = vld [vmem:[#allocation5 + $0x8] sm:$0xff]  ;;  %s958_s13 = smov [#allocation11]  }
  0x5a   :  { %v105_v2 = vld [vmem:[#allocation5 + $0x10] sm:$0xff]  ;;  %v699_v3 = vpack.c.bf16 %v104_v1, %v103_v0  ;;  %v106_v4 = vld [vmem:[#allocation5 + $0x18] sm:$0xff]  ;;  %v198_v7 = vld [vmem:[#allocation7] sm:$0xff]  ;;  %s503_s1 = sshll.u32 %s958_s13, 4  ;;  %s504_s1 = int_to_ptr.vmem [resolvable:$true] %s503_s1 }
  0x5b   :  { %v101_v5 = vld [vmem:[#allocation2] sm:$0xff]  ;;  %v703_v6 = vpack.c.bf16 %v106_v4, %v105_v2  ;;  %v199_v8 = vld [vmem:[#allocation7 + $0x8] sm:$0xff]  ;;  %v201_v11 = vld [vmem:[#allocation7 + $0x18] sm:$0xff]  ;;  %p926_p13 = scmp.lt.s32.totalorder %s504_s1, %s504_s1 }
  0x5c   :  { %591 = vmatprep.mubr.msk.f32.mxu0 %vm114_vm0, %v101_v5  ;;  %v200_v9 = vld [vmem:[#allocation7 + $0x10] sm:$0xff]  ;;  %700 = vmatprep.subr.bf16.mxu0 %v699_v3  ;;  %v707_v10 = vpack.c.bf16 %v199_v8, %v198_v7  ;;  %v202_v13 = vld [vmem:[#allocation7 + $0x20] sm:$0xff]  ;;  %v203_v14 = vld [vmem:[#allocation7 + $0x28] sm:$0xff] }
  0x5d   :  { %702 = vmatpush3.bf16.msra.mxu0 %v699_v3  ;;  %v711_v12 = vpack.c.bf16 %v201_v11, %v200_v9  ;;  %v715_v15 = vpack.c.bf16 %v203_v14, %v202_v13  ;;  %v102_v16 = vld [vmem:[#allocation2 + $0x8] sm:$0xff]  ;;  %v204_v17 = vld [vmem:[#allocation7 + $0x30] sm:$0xff]  ;;  %v206_v20 = vld [vmem:[#allocation7 + $0x40] sm:$0xff] }
  0x5e   :  { %704 = vmatprep.subr.bf16.mxu0 %v703_v6  ;;  %708 = vmatprep.subr.bf16.mxu1 %v707_v10  ;;  %v205_v18 = vld [vmem:[#allocation7 + $0x38] sm:$0xff]  ;;  %v207_v21 = vld [vmem:[#allocation7 + $0x48] sm:$0xff]  ;;  %v208_v23 = vld [vmem:[#allocation7 + $0x50] sm:$0xff] }
  0x5f   :  { %710 = vmatpush3.bf16.msra.mxu1 %v707_v10  ;;  %v719_v19 = vpack.c.bf16 %v205_v18, %v204_v17  ;;  %v723_v22 = vpack.c.bf16 %v207_v21, %v206_v20  ;;  %v209_v24 = vld [vmem:[#allocation7 + $0x58] sm:$0xff]  ;;  %v210_v26 = vld [vmem:[#allocation7 + $0x60] sm:$0xff]  ;;  %v211_v27 = vld [vmem:[#allocation7 + $0x68] sm:$0xff] }
  0x60   :  { %712 = vmatprep.subr.bf16.mxu1 %v711_v12  ;;  %v727_v25 = vpack.c.bf16 %v209_v24, %v208_v23  ;;  %v731_v28 = vpack.c.bf16 %v211_v27, %v210_v26  ;;  %v212_v29 = vld [vmem:[#allocation7 + $0x70] sm:$0xff]  ;;  %v213_v30 = vld [vmem:[#allocation7 + $0x78] sm:$0xff]  ;;  %v298_v32 = vld [vmem:[#allocation8] sm:$0xff] }
  0x61   :  { %706 = vmatpush3.bf16.msra.mxu0 %v703_v6  ;;  %v735_v31 = vpack.c.bf16 %v213_v30, %v212_v29  ;;  %v299_v33 = vld [vmem:[#allocation8 + $0x8] sm:$0xff]  ;;  %v300_v34 = vld [vmem:[#allocation8 + $0x10] sm:$0xff]  ;;  %v301_v36 = vld [vmem:[#allocation8 + $0x18] sm:$0xff] }
  0x62   :  { %v739_v35 = vpack.c.bf16 %v299_v33, %v298_v32  ;;  %v743_v37 = vpack.c.bf16 %v301_v36, %v300_v34  ;;  %v302_v38 = vld [vmem:[#allocation8 + $0x20] sm:$0xff]  ;;  %v303_v39 = vld [vmem:[#allocation8 + $0x28] sm:$0xff]  ;;  %v304_v41 = vld [vmem:[#allocation8 + $0x30] sm:$0xff] }
  0x63   :  { %714 = vmatpush3.bf16.msra.mxu1 %v711_v12  ;;  %v747_v40 = vpack.c.bf16 %v303_v39, %v302_v38  ;;  %v305_v42 = vld [vmem:[#allocation8 + $0x38] sm:$0xff]  ;;  %v306_v44 = vld [vmem:[#allocation8 + $0x40] sm:$0xff]  ;;  %v307_v45 = vld [vmem:[#allocation8 + $0x48] sm:$0xff] }
  0x64   :  { %592 = vmatmul.mubr.msk.f32.vlgmr.msra.gmra.mrb[0].mxu0 %vm114_vm0, %v102_v16  ;;  %716 = vmatprep.subr.bf16.mxu1 %v715_v15  ;;  %v751_v43 = vpack.c.bf16 %v305_v42, %v304_v41  ;;  %v755_v46 = vpack.c.bf16 %v307_v45, %v306_v44  ;;  %v308_v47 = vld [vmem:[#allocation8 + $0x50] sm:$0xff]  ;;  %v309_v48 = vld [vmem:[#allocation8 + $0x58] sm:$0xff]  ;;  %v310_v50 = vld [vmem:[#allocation8 + $0x60] sm:$0xff] }
  0x65   :  { %740 = vmatprep.subr.bf16.mxu0 %v739_v35  ;;  %v759_v49 = vpack.c.bf16 %v309_v48, %v308_v47  ;;  %v311_v51 = vld [vmem:[#allocation8 + $0x68] sm:$0xff]  ;;  %v517_v53 = vld [vmem:[%s1129_s2] ss:$0 sm:$0xff]  ;;  %v313_v61 = vld [vmem:[#allocation8 + $0x78] sm:$0xff] }
  0x66   :  { %742 = vmatpush3.bf16.msra.mxu0 %v739_v35  ;;  %v763_v52 = vpack.c.bf16 %v311_v51, %v310_v50  ;;  %v312_v60 = vld [vmem:[#allocation8 + $0x70] sm:$0xff]  ;;  %v398_v63 = vld [vmem:[#allocation10] sm:$0xff]  ;;  %v399_v0 = vld [vmem:[#allocation10 + $0x8] sm:$0xff] }
  0x67   :  { %718 = vmatpush3.bf16.msra.mxu1 %v715_v15  ;;  %744 = vmatprep.subr.bf16.mxu0 %v743_v37  ;;  %v767_v62 = vpack.c.bf16 %v313_v61, %v312_v60  ;;  %v400_v1 = vld [vmem:[#allocation10 + $0x10] sm:$0xff]  ;;  %v771_v2 = vpack.c.bf16 %v399_v0, %v398_v63  ;;  %v401_v3 = vld [vmem:[#allocation10 + $0x18] sm:$0xff]  ;;  %v402_v5 = vld [vmem:[#allocation10 + $0x20] sm:$0xff] }
  0x68   :  { %720 = vmatprep.subr.bf16.mxu1 %v719_v19  ;;  %v775_v4 = vpack.c.bf16 %v401_v3, %v400_v1  ;;  %v403_v6 = vld [vmem:[#allocation10 + $0x28] sm:$0xff]  ;;  %v404_v8 = vld [vmem:[#allocation10 + $0x30] sm:$0xff]  ;;  %v405_v9 = vld [vmem:[#allocation10 + $0x38] sm:$0xff] }
  0x69   :  { %v779_v7 = vpack.c.bf16 %v403_v6, %v402_v5  ;;  %v783_v10 = vpack.c.bf16 %v405_v9, %v404_v8  ;;  %v406_v11 = vld [vmem:[#allocation10 + $0x40] sm:$0xff]  ;;  %v407_v12 = vld [vmem:[#allocation10 + $0x48] sm:$0xff]  ;;  %v408_v14 = vld [vmem:[#allocation10 + $0x50] sm:$0xff] }
  0x6a   :  { %746 = vmatpush3.bf16.msra.mxu0 %v743_v37  ;;  %v787_v13 = vpack.c.bf16 %v407_v12, %v406_v11  ;;  %v409_v15 = vld [vmem:[#allocation10 + $0x58] sm:$0xff]  ;;  %v410_v17 = vld [vmem:[#allocation10 + $0x60] sm:$0xff]  ;;  %v411_v18 = vld [vmem:[#allocation10 + $0x68] sm:$0xff] }
  0x6b   :  { %722 = vmatpush3.bf16.msra.mxu1 %v719_v19  ;;  %748 = vmatprep.subr.bf16.mxu0 %v747_v40  ;;  %v791_v16 = vpack.c.bf16 %v409_v15, %v408_v14  ;;  %v795_v19 = vpack.c.bf16 %v411_v18, %v410_v17  ;;  %v520_v20 = vld [vmem:[%s1131_s4] ss:$0 sm:$0xff] }
  0x6c   :  { %724 = vmatprep.subr.bf16.mxu1 %v723_v22  ;;  %v412_v27 = vld [vmem:[#allocation10 + $0x70] sm:$0xff] }
  0x6d   :  { %v521_v30 = vld [vmem:[%s1133_s6] ss:$0 sm:$0xff]  ;;  %s921_s6 = scalar_lea.vmem %s504_s1, 256 }
  0x6e   :  { %750 = vmatpush3.bf16.msra.mxu0 %v747_v40  ;;  %v522_v37 = vld [vmem:[%s1135_s8] ss:$0 sm:$0xff]  ;;  %p922_p12 = scmp.ne.s32.totalorder %s504_s1, %s921_s6  ;;  %p927_p0 = scmp.lt.s32.totalorder %s921_s6, %s921_s6 }
  0x6f   :  { %726 = vmatpush3.bf16.msra.mxu1 %v723_v22  ;;  %752 = vmatprep.subr.bf16.mxu0 %v751_v43 }
  0x70   :  { %728 = vmatprep.subr.bf16.mxu1 %v727_v25  ;;  %p928_p1 = por %p927_p0, %p926_p13 }
  0x72   :  { %754 = vmatpush3.bf16.msra.mxu0 %v751_v43  ;;  %p929_p2 = pnand %p928_p1, %p922_p12 }
  0x73   :  { %730 = vmatpush3.bf16.msra.mxu1 %v727_v25  ;;  %756 = vmatprep.subr.bf16.mxu0 %v755_v46 }
  0x74   :  { %732 = vmatprep.subr.bf16.mxu1 %v731_v28 }
  0x76   :  { %758 = vmatpush3.bf16.msra.mxu0 %v755_v46 }
  0x77   :  { %734 = vmatpush3.bf16.msra.mxu1 %v731_v28  ;;  %760 = vmatprep.subr.bf16.mxu0 %v759_v49  ;;  %v413_v28 = vld [vmem:[#allocation10 + $0x78] sm:$0xff] }
  0x78   :  { %736 = vmatprep.subr.bf16.mxu1 %v735_v31  ;;  %v799_v29 = vpack.c.bf16 %v413_v28, %v412_v27 }
  0x7a   :  { %762 = vmatpush3.bf16.msra.mxu0 %v759_v49 }
  0x7b   :  { %738 = vmatpush3.bf16.msra.mxu1 %v735_v31  ;;  %764 = vmatprep.subr.bf16.mxu0 %v763_v52 }
  0x7c   :  { %772 = vmatprep.subr.bf16.mxu1 %v771_v2 }
  0x7e   :  { %766 = vmatpush3.bf16.msra.mxu0 %v763_v52 }
  0x7f   :  { %768 = vmatprep.subr.bf16.mxu0 %v767_v62 }
  0x82   :  { %770 = vmatpush3.bf16.msra.mxu0 %v767_v62 }
 0x137   :  { %v593_v54 = vpop.f32.mrb[0].mxu0 }
 0x138   :  { %v193_v55 = vadd.f32 %v593_v54, %v517_v53  ;;  %v187_v56 = vpop.f32.mrb[1].mxu0 }
 0x139   :  { %v188_v57 = vadd.f32 %v517_v53, %v187_v56 }
 0x13a   :  { %v197_v59 = vmax.f32 %v193_v55, 0.0 }
 0x13b   :  { %v196_v58 = vmax.f32 %v188_v57, 0.0 }
 0x13d   :  { %626 = vmatprep.mubr.f32.mxu1 %v196_v58 }
 0x13e   :  { %627 = vmatmul.mubr.f32.vlgmr.msra.gmra.mrb[0].mxu1 %v197_v59 }
 0x13f   :  { %774 = vmatpush3.bf16.msra.mxu1 %v771_v2 }
 0x140   :  { %776 = vmatprep.subr.bf16.mxu1 %v775_v4 }
 0x143   :  { %778 = vmatpush3.bf16.msra.mxu1 %v775_v4 }
 0x144   :  { %780 = vmatprep.subr.bf16.mxu1 %v779_v7 }
 0x147   :  { %782 = vmatpush3.bf16.msra.mxu1 %v779_v7 }
 0x148   :  { %784 = vmatprep.subr.bf16.mxu1 %v783_v10 }
 0x14b   :  { %786 = vmatpush3.bf16.msra.mxu1 %v783_v10 }
 0x14c   :  { %788 = vmatprep.subr.bf16.mxu1 %v787_v13 }
 0x14f   :  { %790 = vmatpush3.bf16.msra.mxu1 %v787_v13 }
 0x150   :  { %792 = vmatprep.subr.bf16.mxu1 %v791_v16 }
 0x153   :  { %794 = vmatpush3.bf16.msra.mxu1 %v791_v16 }
 0x154   :  { %796 = vmatprep.subr.bf16.mxu1 %v795_v19 }
 0x157   :  { %798 = vmatpush3.bf16.msra.mxu1 %v795_v19 }
 0x158   :  { %800 = vmatprep.subr.bf16.mxu1 %v799_v29 }
 0x15b   :  { %802 = vmatpush3.bf16.msra.mxu1 %v799_v29 }
 0x211   :  { %v628_v21 = vpop.f32.mrb[0].mxu1 }
 0x212   :  { %v293_v22 = vadd.f32 %v628_v21, %v520_v20  ;;  %v287_v23 = vpop.f32.mrb[1].mxu1 }
 0x213   :  { %v288_v24 = vadd.f32 %v520_v20, %v287_v23 }
 0x214   :  { %v297_v26 = vmax.f32 %v293_v22, 0.0 }
 0x215   :  { %v296_v25 = vmax.f32 %v288_v24, 0.0 }
 0x217   :  { %661 = vmatprep.mubr.f32.mxu0 %v296_v25 }
 0x218   :  { %662 = vmatmul.mubr.f32.vlgmr.msra.gmra.mrb[2].mxu0 %v297_v26 }
 0x2eb   :  { %v663_v31 = vpop.f32.mrb[2].mxu0 }
 0x2ec   :  { %v393_v32 = vadd.f32 %v663_v31, %v521_v30  ;;  %v387_v33 = vpop.f32.mrb[3].mxu0 }
 0x2ed   :  { %v388_v34 = vadd.f32 %v521_v30, %v387_v33 }
 0x2ee   :  { %v397_v36 = vmax.f32 %v393_v32, 0.0 }
 0x2ef   :  { %v396_v35 = vmax.f32 %v388_v34, 0.0 }
 0x2f1   :  { %696 = vmatprep.mubr.f32.mxu1 %v396_v35 }
 0x2f2   :  { %697 = vmatmul.mubr.f32.vlgmr.msra.gmra.mrb[2].mxu1 %v397_v36 }
 0x3c5   :  { %v698_v38 = vpop.f32.mrb[2].mxu1 }
 0x3c6   :  { %v493_v39 = vadd.f32 %v698_v38, %v522_v37  ;;  %v487_v40 = vpop.f32.mrb[3].mxu1 }
 0x3c7   :  { %v488_v41 = vadd.f32 %v522_v37, %v487_v40 }
 0x3c8   :  { %497 = vst [vmem:[#allocation11 + $0x8] sm:$0xff] %v493_v39 }
 0x3c9   :  { %496 = vst [vmem:[#allocation11] sm:$0xff] %v488_v41 }
 0x3ca   :  { %932 = shalt.err (!%p929_p2)
}
 0x3cb   :  { %s933_s8 = scalar_lea.hbm %s1136_s9, 256 }
 0x3cc   :  { %p934_p3 = scmp.ne.s32.totalorder %s1136_s9, %s933_s8  ;;  %p937_p4 = scmp.lt.u32.totalorder %s933_s8, %s1136_s9 }
 0x3ce   :  { %p939_p5 = pnand %p937_p4, %p934_p3 }
 0x3d0   :  { %942 = shalt.err (!%p939_p5)
}
 0x3d1   :  { %509 = dma.vmem_to_hbm [thread:$0]  %s504_s1, 256, %s1136_s9, [#allocation4], %s953_s21, %s953_s21, %s954_s22  }
 0x3d2   :  { %949 = dma.done.wait [#allocation4], 256  }
 0x3d3   :  { %950 = vsyncadd [#allocation4], 4294967040 }
 0x3d4   :  { %513 = vsyncpa [#allocation3], 1 }
 0x3d5   :  { %514 = vsyncpa [#allocation6], 1 }
 0x3d6   :  { %515 = vsyncpa [#allocation9], 1 }
 0x3d7   :  { %516 = vsyncpa [#allocation4], 1 }

</bundles_post_ra>
